<compile_context>
chip_gen: v7x
topology: tpu7x:2x2x1
jax: 0.10.0
libtpu: 0.0.40
codegen_flags: <defaults>
</compile_context>

<pallas_src>
import functools

import jax
import jax.numpy as jnp
from jax.experimental import pallas as pl
from jax.experimental.pallas import tpu as pltpu


def _channel_attention_kernel(x_ref, w1t_ref, w2t_ref, out_ref,
                              max_sc, sum_sc, *, hw_total, hw_block, mask_hw):
    """Grid = (batch_blocks, hw_chunks).  hw chunk axis is last ('arbitrary')."""
    k = pl.program_id(1)
    Bt, C, HWt = x_ref.shape

    @pl.when(k == 0)
    def _():
        max_sc[...] = jnp.full_like(max_sc, -jnp.inf)
        sum_sc[...] = jnp.zeros_like(sum_sc)

    x = x_ref[...]                                    # (Bt, C, HWt), native dtype

    if mask_hw:
        # Partial last spatial chunk: mask out-of-range lanes.
        lane = jax.lax.broadcasted_iota(jnp.int32, x.shape, 2)
        valid = (k * hw_block + lane) < hw_total
        if jnp.issubdtype(x.dtype, jnp.floating):
            neg = jnp.asarray(-jnp.inf, x.dtype)
        else:
            neg = jnp.asarray(jnp.iinfo(x.dtype).min, x.dtype)
        x_max = jnp.where(valid, x, neg)
        x_sum = jnp.where(valid, x, jnp.asarray(0, x.dtype)).astype(jnp.float32)
    else:
        x_max = x
        x_sum = x.astype(jnp.float32)

    # Running pools: max in native dtype (exact for bf16), sum accumulated f32.
    max_sc[...] = jnp.maximum(max_sc[...],
                              jnp.max(x_max, axis=-1).astype(jnp.float32))
    sum_sc[...] = sum_sc[...] + jnp.sum(x_sum, axis=-1)

    @pl.when(k == pl.num_programs(1) - 1)
    def _():
        mx = max_sc[...]                              # (Bt, C) f32
        av = sum_sc[...] * (1.0 / hw_total)           # (Bt, C) f32
        # Shared SE MLP, one matmul for all 2*Bt pooled vectors.
        pooled = jnp.concatenate([mx, av], axis=0)    # (2*Bt, C)
        h = jnp.maximum(
            jnp.dot(pooled, w1t_ref[...].astype(jnp.float32),
                    preferred_element_type=jnp.float32), 0.0)     # (2*Bt, Cr)
        se = jnp.dot(h, w2t_ref[...].astype(jnp.float32),
                     preferred_element_type=jnp.float32)          # (2*Bt, C)
        gate = jax.nn.sigmoid(se[:Bt] + se[Bt:])                  # (Bt, C)
        out_ref[...] = gate.reshape(Bt, 1, C).astype(out_ref.dtype)


def channel_attention_forward(x, w1, w2, *, block_b=None, hw_block=None):
    """x: (B, C, H, W).  w1: (C//r, C) (Conv2d(C, C//r, 1, bias=False).weight
    squeezed).  w2: (C, C//r).  Returns the channel-attention map (B, C, 1, 1)."""
    B, C, H, W = x.shape
    Cr = w1.shape[0]
    HW = H * W

    x3 = x.reshape(B, C, HW)              # metadata-only reshape in NCHW
    w1t = jnp.transpose(w1)               # (C, Cr)
    w2t = jnp.transpose(w2)               # (Cr, C)

    # ---- generation-aware VMEM budgets ----
    kind = ""
    try:
        kind = jax.devices()[0].device_kind.lower()
    except Exception:
        pass
    is_v7 = "7" in kind                   # v7x: 64 MiB VMEM/TC, 2 TensorCores
    if is_v7:
        input_budget = 20 << 20           # per buffered input block
        vmem_cap = 48 << 20               # never request the full 64 MiB
    else:
        input_budget = 40 << 20           # v5e/v6e: 128 MiB physical VMEM
        vmem_cap = 100 << 20

    # (itemsize + 4) B/elem covers the transient f32 sum / masking work.
    bytes_per_elem = x.dtype.itemsize + 4
    bytes_per_image = C * HW * bytes_per_elem

    # ---- spatial chunking only if a single image blows the budget ----
    if hw_block is None:
        if bytes_per_image <= input_budget:
            hw_block = HW
        else:
            hw_block = (input_budget // (C * bytes_per_elem)) // 128 * 128
            hw_block = int(max(128, min(hw_block, HW)))
    nk = int(pl.cdiv(HW, hw_block))
    mask_hw = (nk * hw_block != HW)

    # ---- batch blocking (no divisibility requirement; cdiv grid) ----
    bytes_per_image_chunk = C * hw_block * bytes_per_elem
    if block_b is None:
        cap_b = max(1, input_budget // bytes_per_image_chunk)
        cap_b = min(cap_b, B)
        if is_v7 and B >= 2:
            cap_b = min(cap_b, int(pl.cdiv(B, 2)))   # >= 2 steps -> both TCs busy
        if cap_b >= 8 and B >= 8:
            cap_b = (cap_b // 8) * 8                 # sublane-aligned pooled concat
        block_b = int(max(1, cap_b))
    nb = int(pl.cdiv(B, block_b))

    block_bytes = block_b * C * hw_block * bytes_per_elem
    vmem_limit = int(max(16 << 20, min(vmem_cap, 2 * block_bytes + (8 << 20))))

    kernel = functools.partial(_channel_attention_kernel,
                               hw_total=HW, hw_block=hw_block, mask_hw=mask_hw)

    gate = pl.pallas_call(
        kernel,
        out_shape=jax.ShapeDtypeStruct((B, 1, C), jnp.float32),
        grid_spec=pltpu.PrefetchScalarGridSpec(
            num_scalar_prefetch=0,
            grid=(nb, nk),
            in_specs=[
                pl.BlockSpec((block_b, C, hw_block), lambda b, k: (b, 0, k)),
                pl.BlockSpec((C, Cr), lambda b, k: (0, 0)),   # SE weight 1 (pre-T)
                pl.BlockSpec((Cr, C), lambda b, k: (0, 0)),   # SE weight 2 (pre-T)
            ],
            out_specs=pl.BlockSpec((block_b, 1, C), lambda b, k: (b, 0, 0)),
            scratch_shapes=[
                pltpu.VMEM((block_b, C), jnp.float32),        # running max
                pltpu.VMEM((block_b, C), jnp.float32),        # running sum
            ],
        ),
        compiler_params=pltpu.CompilerParams(
            dimension_semantics=("parallel", "arbitrary"),
            vmem_limit_bytes=vmem_limit),
    )(x3, w1t, w2t)

    return gate.reshape(B, C, 1, 1).astype(x.dtype)


def channel_attention_reference(x, w1, w2):
    """Pure-JAX reference mirroring the PyTorch module (NCHW)."""
    mx = jnp.max(x, axis=(2, 3))                  # (B, C)
    av = jnp.mean(x, axis=(2, 3))                 # (B, C)

    def se(v):
        return jax.nn.relu(v @ w1.T) @ w2.T

    return jax.nn.sigmoid(se(mx) + se(av))[:, :, None, None]


if __name__ == "__main__":
    key = jax.random.PRNGKey(0)
    k1, k2, k3, k4 = jax.random.split(key, 4)

    # ChannelAttention(channel=64, reduction=16)
    B, C, H, W = 2, 64, 16, 16
    Cr = C // 16
    x = jax.random.normal(k1, (B, C, H, W), jnp.float32)
    w1 = jax.random.normal(k2, (Cr, C), jnp.float32) * 0.1   # Conv2d(C, C//r, 1, bias=False)
    w2 = jax.random.normal(k3, (C, Cr), jnp.float32) * 0.1   # Conv2d(C//r, C, 1, bias=False)

    out = jax.block_until_ready(channel_attention_forward(x, w1, w2))
    ref = channel_attention_reference(x, w1, w2)
    assert out.shape == (B, C, 1, 1)
    assert jnp.allclose(out, ref, atol=1e-5, rtol=1e-5), float(jnp.max(jnp.abs(out - ref)))

    # Exercise the spatial-chunk accumulator path (nk > 1) and tiny batch blocks.
    out2 = jax.block_until_ready(
        channel_attention_forward(x, w1, w2, block_b=1, hw_block=128))
    assert jnp.allclose(out2, ref, atol=1e-5, rtol=1e-5), float(jnp.max(jnp.abs(out2 - ref)))

    # Odd batch + HW not a multiple of the lane chunk (partial blocks + mask).
    xb = jax.random.normal(k4, (3, C, 12, 12), jnp.float32)
    out3 = jax.block_until_ready(
        channel_attention_forward(xb, w1, w2, hw_block=128))
    ref3 = channel_attention_reference(xb, w1, w2)
    assert out3.shape == (3, C, 1, 1)
    assert jnp.allclose(out3, ref3, atol=1e-5, rtol=1e-5), float(jnp.max(jnp.abs(out3 - ref3)))

    print("KERNEL_OK")
</pallas_src>

<mosaic_0001>
module attributes {stable_mosaic.version = 11 : i64} {
  func.func @_channel_attention_kernel(%arg0: i32, %arg1: i32, %arg2: memref<2x64x256xf32, #tpu.memory_space<vmem>>, %arg3: memref<64x4xf32, #tpu.memory_space<vmem>>, %arg4: memref<4x64xf32, #tpu.memory_space<vmem>>, %arg5: memref<2x1x64xf32, #tpu.memory_space<vmem>>, %arg6: memref<2x64xf32, #tpu.memory_space<vmem>>, %arg7: memref<2x64xf32, #tpu.memory_space<vmem>>) attributes {dimension_semantics = [#tpu.dimension_semantics<parallel>, #tpu.dimension_semantics<arbitrary>], iteration_bounds = array<i64: 1, 1>, scalar_prefetch = 0 : i64, scratch_operands = 2 : i64, tpu.core_type = #tpu.core_type<tc>, window_params = [{transform_indices = @transform_0, window_bounds = array<i64: 2, 64, 256>}, {pipeline_mode = #tpu.pipeline_mode<synchronous>, transform_indices = @transform_1, window_bounds = array<i64: 64, 4>}, {pipeline_mode = #tpu.pipeline_mode<synchronous>, transform_indices = @transform_2, window_bounds = array<i64: 4, 64>}, {transform_indices = @transform_3, window_bounds = array<i64: 2, 1, 64>}]} {
    %c0_i32 = arith.constant 0 : i32
    %0 = arith.cmpi eq, %arg1, %c0_i32 : i32
    %1 = arith.extui %0 : i1 to i32
    %c0_i32_0 = arith.constant 0 : i32
    %2 = arith.cmpi ne, %1, %c0_i32_0 : i32
    scf.if %2 {
      %cst_14 = arith.constant 0xFF800000 : f32
      %15 = vector.broadcast %cst_14 : f32 to vector<2x64xf32>
      %c0_15 = arith.constant 0 : index
      %c0_16 = arith.constant 0 : index
      %16 = vector.load %arg6[%c0_15, %c0_16] : memref<2x64xf32, #tpu.memory_space<vmem>>, vector<2x64xf32>
      tpu.vector_store %arg6[%c0_15, %c0_16], %15 {strides = array<i32>} : memref<2x64xf32, #tpu.memory_space<vmem>>, vector<2x64xf32>,
      %cst_17 = arith.constant 0.000000e+00 : f32
      %17 = vector.broadcast %cst_17 : f32 to vector<2x64xf32>
      %c0_18 = arith.constant 0 : index
      %c0_19 = arith.constant 0 : index
      %18 = vector.load %arg7[%c0_18, %c0_19] : memref<2x64xf32, #tpu.memory_space<vmem>>, vector<2x64xf32>
      tpu.vector_store %arg7[%c0_18, %c0_19], %17 {strides = array<i32>} : memref<2x64xf32, #tpu.memory_space<vmem>>, vector<2x64xf32>,
    } else {
    }
    %c0 = arith.constant 0 : index
    %c0_1 = arith.constant 0 : index
    %c0_2 = arith.constant 0 : index
    %3 = vector.load %arg2[%c0, %c0_1, %c0_2] : memref<2x64x256xf32, #tpu.memory_space<vmem>>, vector<2x64x256xf32>
    %c0_3 = arith.constant 0 : index
    %c0_4 = arith.constant 0 : index
    %4 = vector.load %arg6[%c0_3, %c0_4] : memref<2x64xf32, #tpu.memory_space<vmem>>, vector<2x64xf32>
    %cst = arith.constant dense<0xFF800000> : vector<2x64xf32>
    %5 = vector.multi_reduction <maximumf>, %3, %cst [2] : vector<2x64x256xf32> to vector<2x64xf32>
    %6 = arith.maximumf %4, %5 : vector<2x64xf32>
    %c0_5 = arith.constant 0 : index
    %c0_6 = arith.constant 0 : index
    %7 = vector.load %arg6[%c0_5, %c0_6] : memref<2x64xf32, #tpu.memory_space<vmem>>, vector<2x64xf32>
    tpu.vector_store %arg6[%c0_5, %c0_6], %6 {strides = array<i32>} : memref<2x64xf32, #tpu.memory_space<vmem>>, vector<2x64xf32>,
    %c0_7 = arith.constant 0 : index
    %c0_8 = arith.constant 0 : index
    %8 = vector.load %arg7[%c0_7, %c0_8] : memref<2x64xf32, #tpu.memory_space<vmem>>, vector<2x64xf32>
    %cst_9 = arith.constant dense<0.000000e+00> : vector<2x64xf32>
    %9 = vector.multi_reduction <add>, %3, %cst_9 [2] : vector<2x64x256xf32> to vector<2x64xf32>
    %10 = arith.addf %8, %9 : vector<2x64xf32>
    %c0_10 = arith.constant 0 : index
    %c0_11 = arith.constant 0 : index
    %11 = vector.load %arg7[%c0_10, %c0_11] : memref<2x64xf32, #tpu.memory_space<vmem>>, vector<2x64xf32>
    tpu.vector_store %arg7[%c0_10, %c0_11], %10 {strides = array<i32>} : memref<2x64xf32, #tpu.memory_space<vmem>>, vector<2x64xf32>,
    %c0_i32_12 = arith.constant 0 : i32
    %12 = arith.cmpi eq, %arg1, %c0_i32_12 : i32
    %13 = arith.extui %12 : i1 to i32
    %c0_i32_13 = arith.constant 0 : i32
    %14 = arith.cmpi ne, %13, %c0_i32_13 : i32
    scf.if %14 {
      %c0_14 = arith.constant 0 : index
      %c0_15 = arith.constant 0 : index
      %15 = vector.load %arg6[%c0_14, %c0_15] : memref<2x64xf32, #tpu.memory_space<vmem>>, vector<2x64xf32>
      %c0_16 = arith.constant 0 : index
      %c0_17 = arith.constant 0 : index
      %16 = vector.load %arg7[%c0_16, %c0_17] : memref<2x64xf32, #tpu.memory_space<vmem>>, vector<2x64xf32>
      %cst_18 = arith.constant 3.906250e-03 : f32
      %17 = vector.broadcast %cst_18 : f32 to vector<2x64xf32>
      %18 = arith.mulf %16, %17 : vector<2x64xf32>
      %19 = tpu.concatenate %15, %18 in 0 : vector<2x64xf32>, vector<2x64xf32> -> vector<4x64xf32>
      %c0_19 = arith.constant 0 : index
      %c0_20 = arith.constant 0 : index
      %20 = vector.load %arg3[%c0_19, %c0_20] : memref<64x4xf32, #tpu.memory_space<vmem>>, vector<64x4xf32>
      %cst_21 = arith.constant dense<0.000000e+00> : vector<4x4xf32>
      %21 = tpu.matmul %19, %20, %cst_21 {dimension_numbers = #tpu.dot_dimension_numbers<[1], [0], [0], [1], [0, 0, 1, 1], [], []>} : vector<4x64xf32>, vector<64x4xf32>, vector<4x4xf32> -> vector<4x4xf32>
      %cst_22 = arith.constant 0.000000e+00 : f32
      %22 = vector.broadcast %cst_22 : f32 to vector<4x4xf32>
      %23 = arith.maximumf %21, %22 : vector<4x4xf32>
      %c0_23 = arith.constant 0 : index
      %c0_24 = arith.constant 0 : index
      %24 = vector.load %arg4[%c0_23, %c0_24] : memref<4x64xf32, #tpu.memory_space<vmem>>, vector<4x64xf32>
      %cst_25 = arith.constant dense<0.000000e+00> : vector<4x64xf32>
      %25 = tpu.matmul %23, %24, %cst_25 {dimension_numbers = #tpu.dot_dimension_numbers<[1], [0], [0], [1], [0, 0, 1, 1], [], []>} : vector<4x4xf32>, vector<4x64xf32>, vector<4x64xf32> -> vector<4x64xf32>
      %26 = vector.extract_strided_slice %25 {offsets = [0, 0], sizes = [2, 64], strides = [1, 1]} : vector<4x64xf32> to vector<2x64xf32>
      %27 = vector.extract_strided_slice %25 {offsets = [2, 0], sizes = [2, 64], strides = [1, 1]} : vector<4x64xf32> to vector<2x64xf32>
      %28 = arith.addf %26, %27 : vector<2x64xf32>
      %29 = arith.negf %28 : vector<2x64xf32>
      %30 = math.exp %29 : vector<2x64xf32>
      %cst_26 = arith.constant 1.000000e+00 : f32
      %31 = vector.broadcast %cst_26 : f32 to vector<2x64xf32>
      %32 = arith.addf %31, %30 : vector<2x64xf32>
      %33 = arith.divf %31, %32 : vector<2x64xf32>
      %34 = vector.shape_cast %33 : vector<2x64xf32> to vector<2x1x64xf32>
      %c0_27 = arith.constant 0 : index
      %c0_28 = arith.constant 0 : index
      %c0_29 = arith.constant 0 : index
      %35 = vector.load %arg5[%c0_27, %c0_28, %c0_29] : memref<2x1x64xf32, #tpu.memory_space<vmem>>, vector<2x1x64xf32>
      tpu.vector_store %arg5[%c0_27, %c0_28, %c0_29], %34 {strides = array<i32>} : memref<2x1x64xf32, #tpu.memory_space<vmem>>, vector<2x1x64xf32>,
    } else {
    }
    return
  }
  func.func @transform_0(%arg0: i32, %arg1: i32) -> (i32, i32, i32) {
    %c0_i32 = arith.constant 0 : i32
    %c0_i32_0 = arith.constant 0 : i32
    return %arg0, %c0_i32, %arg1 : i32, i32, i32
  }
  func.func @transform_1(%arg0: i32, %arg1: i32) -> (i32, i32) {
    %c0_i32 = arith.constant 0 : i32
    %c0_i32_0 = arith.constant 0 : i32
    %c0_i32_1 = arith.constant 0 : i32
    return %c0_i32, %c0_i32_0 : i32, i32
  }
  func.func @transform_2(%arg0: i32, %arg1: i32) -> (i32, i32) {
    %c0_i32 = arith.constant 0 : i32
    %c0_i32_0 = arith.constant 0 : i32
    %c0_i32_1 = arith.constant 0 : i32
    return %c0_i32, %c0_i32_0 : i32, i32
  }
  func.func @transform_3(%arg0: i32, %arg1: i32) -> (i32, i32, i32) {
    %c0_i32 = arith.constant 0 : i32
    %c0_i32_0 = arith.constant 0 : i32
    %c0_i32_1 = arith.constant 0 : i32
    return %arg0, %c0_i32, %c0_i32_0 : i32, i32, i32
  }
}

</mosaic_0001>

<bundles_post_ra>
// kernel: tpu_custom_call.1
= control target key start
LH: loop header
LB: loop body
LE: loop exit
PB: predicated region body
PF: predicated region fallthrough
CT: control target
= control target key end

     0   :  { %8 = vsyncpa [#allocation5], 0  ;;  %s916_s0 = inlined_call_operand.hbm [shape: f32[2,64,256], index: 0, kind: input, shape index: {}]   ;;  %s917_s1 = inlined_call_operand.vmem [shape: f32[64,4], index: 1, kind: input, shape index: {}]   ;;  %s918_s2 = inlined_call_operand.vmem [shape: f32[4,64], index: 2, kind: input, shape index: {}]   ;;  %s919_s3 = inlined_call_operand.hbm [shape: f32[2,1,64], index: 3, kind: output, shape index: {}]  }
   0x1   :  { %9 = vsyncpa [#allocation6], 0  ;;  %s721_s12 = smov [#allocation4]   ;;  %s673_s16 = scalar_lea.hbm %s916_s0, 4096 }
   0x2   :  { %s15_s13 = sshll.u32 %s721_s12, 4  ;;  %p674_p0 = scmp.ne.s32.totalorder %s916_s0, %s673_s16  ;;  %s16_s13 = int_to_ptr.vmem [resolvable:$true] %s15_s13 }
   0x3   :  { %p677_p1 = scmp.lt.u32.totalorder %s673_s16, %s916_s0 }
   0x5   :  { %p679_p2 = pnand %p677_p1, %p674_p0 }
   0x7   :  { %682 = shalt.err (!%p679_p2)
}
   0x8   :  { %s683_s21 = scalar_lea.vmem %s16_s13, 4096  ;;  %p688_p4 = scmp.lt.s32.totalorder %s16_s13, %s16_s13 }
   0x9   :  { %p684_p3 = scmp.ne.s32.totalorder %s16_s13, %s683_s21  ;;  %p689_p5 = scmp.lt.s32.totalorder %s683_s21, %s683_s21 }
   0xb   :  { %p690_p6 = por %p689_p5, %p688_p4 }
   0xd   :  { %p691_p7 = pnand %p690_p6, %p684_p3 }
   0xf   :  { %694 = shalt.err (!%p691_p7)
}
  0x10   :  { %s722_s22 = smov 256   ;;  %s723_s23 = smov 16  }
  0x11   :  { %21 = dma.hbm_to_vmem [thread:$0]  %s916_s0, 4096, %s16_s13, [#allocation5], %s722_s22, %s722_s22, %s723_s23  }
  0x12   :  { %717 = dma.done.wait [#allocation5], 4096  }
  0x13   :  { %718 = vsyncadd [#allocation5], 4294963200  ;;  %v52_v0 = vld [vmem:[#allocation4 + $0x80] sm:$0xff]  ;;  %v53_v1 = vld [vmem:[#allocation4 + $0x88] sm:$0xff]  ;;  %vm33_vm0 = vcmask 517120   ;;  %v724_v62 = vmov 0.0  }
  0x14   :  { %v36_v2 = vld [vmem:[#allocation4] sm:$0xff]  ;;  %v258_v3 = vadd.f32 %v53_v1, %v52_v0  ;;  %v37_v4 = vld [vmem:[#allocation4 + $0x8] sm:$0xff]  ;;  %v54_v5 = vld [vmem:[#allocation4 + $0x90] sm:$0xff]  ;;  %v93_v33 = vmax.f32 %v52_v0, %v53_v1  ;;  %35 = vst.msk [vmem:[#allocation3] sm:$0x3] %vm33_vm0, %v724_v62  ;;  %642 = vmatprep.subr.mxu1 %v724_v62  ;;  %v725_v1 = vmov -inf  }
  0x15   :  { %v55_v6 = vld [vmem:[#allocation4 + $0x98] sm:$0xff]  ;;  %v234_v7 = vadd.f32 %v37_v4, %v36_v2  ;;  %v38_v8 = vld [vmem:[#allocation4 + $0x10] sm:$0xff]  ;;  %v56_v12 = vld [vmem:[#allocation4 + $0xa0] sm:$0xff]  ;;  %v69_v31 = vmax.f32 %v36_v2, %v37_v4  ;;  %34 = vst.msk [vmem:[#allocation2] sm:$0x3] %vm33_vm0, %v725_v1  ;;  %vm727_vm1 = vmmov 0  }
  0x16   :  { %v39_v9 = vld [vmem:[#allocation4 + $0x18] sm:$0xff]  ;;  %259 = vadd.xlane.f32.xlu1 %v258_v3  ;;  %v261_v10 = vadd.f32 %v55_v6, %v54_v5  ;;  %v57_v13 = vld [vmem:[#allocation4 + $0xa8] sm:$0xff]  ;;  %v40_v14 = vld [vmem:[#allocation4 + $0x20] sm:$0xff]  ;;  %v96_v32 = vmax.f32 %v54_v5, %v55_v6  ;;  %v726_v5 = vmov 0.0|0.0   ;;  %639 = vmatprep.mubr.msk.f32.mxu0 %vm727_vm1, %v724_v62  ;;  %vm144_vm2 = vcmask 130112  }
  0x17   :  { %235 = vadd.xlane.f32.xlu0 %v234_v7  ;;  %v237_v11 = vadd.f32 %v39_v9, %v38_v8  ;;  %v41_v15 = vld [vmem:[#allocation4 + $0x28] sm:$0xff]  ;;  %v264_v16 = vadd.f32 %v57_v13, %v56_v12  ;;  %v58_v18 = vld [vmem:[#allocation4 + $0xb0] sm:$0xff]  ;;  %v59_v19 = vld [vmem:[#allocation4 + $0xb8] sm:$0xff]  ;;  %v72_v30 = vmax.f32 %v38_v8, %v39_v9  ;;  %v99_v40 = vmax.f32 %v56_v12, %v57_v13 }
  0x18   :  { %v240_v17 = vadd.f32 %v41_v15, %v40_v14  ;;  %v42_v20 = vld [vmem:[#allocation4 + $0x30] sm:$0xff]  ;;  %v43_v21 = vld [vmem:[#allocation4 + $0x38] sm:$0xff]  ;;  %v267_v22 = vadd.f32 %v59_v19, %v58_v18  ;;  %v60_v24 = vld [vmem:[#allocation4 + $0xc0] sm:$0xff]  ;;  %v75_v41 = vmax.f32 %v40_v14, %v41_v15  ;;  %v102_v48 = vmax.f32 %v58_v18, %v59_v19  ;;  %647 = vmatprep.subr.bf16.mxu0 %v726_v5 }
  0x19   :  { %v243_v23 = vadd.f32 %v43_v21, %v42_v20  ;;  %v61_v25 = vld [vmem:[#allocation4 + $0xc8] sm:$0xff]  ;;  %v44_v26 = vld [vmem:[#allocation4 + $0x40] sm:$0xff]  ;;  %v62_v34 = vld [vmem:[#allocation4 + $0xd0] sm:$0xff]  ;;  %v78_v49 = vmax.f32 %v42_v20, %v43_v21  ;;  %644 = vmatprep.mubr.msk.f32.mxu1 %vm727_vm1, %v724_v62  ;;  %vm151_vm3 = vcmask 195712   ;;  %vm158_vm4 = vcmask 261312  }
  0x1a   :  { %262 = vadd.xlane.f32.xlu1 %v261_v10  ;;  %v45_v27 = vld [vmem:[#allocation4 + $0x48] sm:$0xff]  ;;  %v270_v28 = vadd.f32 %v61_v25, %v60_v24  ;;  %v63_v35 = vld [vmem:[#allocation4 + $0xd8] sm:$0xff]  ;;  %v46_v36 = vld [vmem:[#allocation4 + $0x50] sm:$0xff]  ;;  %v105_v56 = vmax.f32 %v60_v24, %v61_v25  ;;  %vm165_vm5 = vcmask 326912   ;;  %vm172_vm6 = vcmask 392512  }
  0x1b   :  { %238 = vadd.xlane.f32.xlu0 %v237_v11  ;;  %v246_v29 = vadd.f32 %v45_v27, %v44_v26  ;;  %v47_v37 = vld [vmem:[#allocation4 + $0x58] sm:$0xff]  ;;  %v273_v38 = vadd.f32 %v63_v35, %v62_v34  ;;  %v64_v42 = vld [vmem:[#allocation4 + $0xe0] sm:$0xff]  ;;  %v65_v43 = vld [vmem:[#allocation4 + $0xe8] sm:$0xff]  ;;  %v81_v57 = vmax.f32 %v44_v26, %v45_v27  ;;  %v108_v58 = vmax.f32 %v62_v34, %v63_v35 }
  0x1c   :  { %v249_v39 = vadd.f32 %v47_v37, %v46_v36  ;;  %v48_v44 = vld [vmem:[#allocation4 + $0x60] sm:$0xff]  ;;  %v49_v45 = vld [vmem:[#allocation4 + $0x68] sm:$0xff]  ;;  %v276_v46 = vadd.f32 %v65_v43, %v64_v42  ;;  %v66_v50 = vld [vmem:[#allocation4 + $0xf0] sm:$0xff]  ;;  %v84_v59 = vmax.f32 %v46_v36, %v47_v37  ;;  %v111_v60 = vmax.f32 %v64_v42, %v65_v43 }
  0x1d   :  { %v252_v47 = vadd.f32 %v49_v45, %v48_v44  ;;  %v67_v51 = vld [vmem:[#allocation4 + $0xf8] sm:$0xff]  ;;  %v50_v52 = vld [vmem:[#allocation4 + $0x70] sm:$0xff]  ;;  %v87_v61 = vmax.f32 %v48_v44, %v49_v45  ;;  %v392_v3 = vld [vmem:[%s917_s1 + $0x8] sm:$0xff]  ;;  %v133_v27 = vlaneseq  ;;  %vm179_vm7 = vcmask 458112  }
  0x1e   :  { %265 = vadd.xlane.f32.xlu1 %v264_v16  ;;  %v51_v53 = vld [vmem:[#allocation4 + $0x78] sm:$0xff]  ;;  %v279_v54 = vadd.f32 %v67_v51, %v66_v50  ;;  %v114_v63 = vmax.f32 %v66_v50, %v67_v51  ;;  %v393_v6 = vld [vmem:[%s917_s1 + $0x10] sm:$0xff]  ;;  %v396_v10 = vld [vmem:[%s917_s1 + $0x28] sm:$0xff]  ;;  %vm186_vm8 = vcmask 523712   ;;  %vm227_vm9 = vcmask 1041409  }
  0x1f   :  { %241 = vadd.xlane.f32.xlu0 %v240_v17  ;;  %v255_v55 = vadd.f32 %v51_v53, %v50_v52  ;;  %v90_v0 = vmax.f32 %v50_v52, %v51_v53  ;;  %v391_v2 = vld [vmem:[%s917_s1] sm:$0xff]  ;;  %v394_v7 = vld [vmem:[%s917_s1 + $0x18] sm:$0xff]  ;;  %v397_v12 = vld [vmem:[%s917_s1 + $0x30] sm:$0xff]  ;;  %v798_v35 = vshrl.u32 %v133_v27, 7  ;;  %vm389_vm10 = vcmask 1041408  }
  0x20   :  { %v648_v4 = vpack.c.bf16 %v392_v3, %v391_v2  ;;  %v651_v8 = vpack.c.bf16 %v394_v7, %v393_v6  ;;  %v395_v9 = vld [vmem:[%s917_s1 + $0x20] sm:$0xff]  ;;  %v398_v13 = vld [vmem:[%s917_s1 + $0x38] sm:$0xff]  ;;  %vm399_vm11 = vcmask 523264   ;;  %vm479_vm12 = vcmask 1043456  }
  0x21   :  { %v654_v11 = vpack.c.bf16 %v396_v10, %v395_v9  ;;  %v657_v14 = vpack.c.bf16 %v398_v13, %v397_v12  ;;  %vm475_vm13 = vcmask 31744   ;;  %vm588_vm14 = vcmask 516096  }
  0x22   :  { %268 = vadd.xlane.f32.xlu1 %v267_v22  ;;  %649 = vmatpush3.bf16.msra.mxu0 %v648_v4 }
  0x23   :  { %244 = vadd.xlane.f32.xlu0 %v243_v23  ;;  %650 = vmatprep.subr.bf16.mxu0 %v726_v5 }
  0x26   :  { %271 = vadd.xlane.f32.xlu1 %v270_v28  ;;  %652 = vmatpush3.bf16.msra.mxu0 %v651_v8 }
  0x27   :  { %247 = vadd.xlane.f32.xlu0 %v246_v29  ;;  %653 = vmatprep.subr.bf16.mxu0 %v726_v5 }
  0x2a   :  { %73 = vmax.xlane.f32.xlu1 %v72_v30  ;;  %655 = vmatpush3.bf16.msra.mxu0 %v654_v11  ;;  %v134_v30 = vand.u32 127, %v133_v27 }
  0x2b   :  { %70 = vmax.xlane.f32.xlu0 %v69_v31  ;;  %656 = vmatprep.subr.bf16.mxu0 %v726_v5 }
  0x2c   :  { %v146_v34 = vadd.s32 4294967280, %v134_v30  ;;  %v153_v36 = vadd.s32 4294967272, %v134_v30  ;;  %v160_v37 = vadd.s32 4294967264, %v134_v30  ;;  %v174_v43 = vadd.s32 4294967248, %v134_v30 }
  0x2d   :  { %v811_v44 = vsub.s32 %v134_v30, %v798_v35  ;;  %v181_v51 = vadd.s32 4294967240, %v134_v30 }
  0x2e   :  { %97 = vmax.xlane.f32.xlu1 %v96_v32  ;;  %658 = vmatpush3.bf16.msra.mxu0 %v657_v14  ;;  %v139_v32 = vadd.s32 4294967288, %v134_v30  ;;  %v808_v42 = vsub.s32 %v146_v34, %v798_v35  ;;  %v814_v45 = vsub.s32 %v153_v36, %v798_v35 }
  0x2f   :  { %94 = vmax.xlane.f32.xlu0 %v93_v33  ;;  %v838_v2 = vsub.s32 %v181_v51, %v798_v35 }
  0x32   :  { %274 = vadd.xlane.f32.xlu1 %v273_v38 }
  0x33   :  { %250 = vadd.xlane.f32.xlu0 %v249_v39  ;;  %v803_v39 = vsub.s32 %v139_v32, %v798_v35 }
  0x36   :  { %100 = vmax.xlane.f32.xlu1 %v99_v40  ;;  %v167_v40 = vadd.s32 4294967256, %v134_v30 }
  0x37   :  { %76 = vmax.xlane.f32.xlu0 %v75_v41 }
  0x3a   :  { %277 = vadd.xlane.f32.xlu1 %v276_v46  ;;  %v817_v46 = vsub.s32 %v160_v37, %v798_v35 }
  0x3b   :  { %253 = vadd.xlane.f32.xlu0 %v252_v47 }
  0x3e   :  { %103 = vmax.xlane.f32.xlu1 %v102_v48 }
  0x3f   :  { %79 = vmax.xlane.f32.xlu0 %v78_v49  ;;  %v821_v49 = vsub.s32 %v167_v40, %v798_v35 }
  0x42   :  { %280 = vadd.xlane.f32.xlu1 %v279_v54  ;;  %v826_v54 = vsub.s32 %v174_v43, %v798_v35 }
  0x43   :  { %256 = vadd.xlane.f32.xlu0 %v255_v55 }
  0x46   :  { %106 = vmax.xlane.f32.xlu1 %v105_v56 }
  0x47   :  { %82 = vmax.xlane.f32.xlu0 %v81_v57 }
  0x4a   :  { %109 = vmax.xlane.f32.xlu1 %v108_v58 }
  0x4b   :  { %85 = vmax.xlane.f32.xlu0 %v84_v59 }
  0x4e   :  { %112 = vmax.xlane.f32.xlu1 %v111_v60 }
  0x4f   :  { %88 = vmax.xlane.f32.xlu0 %v87_v61 }
  0x52   :  { %115 = vmax.xlane.f32.xlu1 %v114_v63 }
  0x53   :  { %91 = vmax.xlane.f32.xlu0 %v90_v0 }
  0xa3   :  { %v260_v15 = vpop.xlane.xlu1 %259 }
  0xa4   :  { %v236_v16 = vpop.xlane.xlu0 %235  ;;  %v340_v55 = vrot.slane %v260_v15, %v811_v44 }
  0xa5   :  { %v301_v58 = vrot.slane %v236_v16, %v811_v44 }
  0xa7   :  { %v263_v17 = vpop.xlane.xlu1 %262 }
  0xa8   :  { %v239_v18 = vpop.xlane.xlu0 %238  ;;  %v344_v48 = vrot.slane %v263_v17, %v803_v39 }
  0xa9   :  { %v305_v52 = vrot.slane %v239_v18, %v803_v39 }
  0xaa   :  { %v345_v62 = vsel %vm144_vm2, %v344_v48, %v340_v55 }
  0xab   :  { %v266_v19 = vpop.xlane.xlu1 %265  ;;  %v306_v3 = vsel %vm144_vm2, %v305_v52, %v301_v58 }
  0xac   :  { %v242_v20 = vpop.xlane.xlu0 %241  ;;  %v349_v53 = vrot.slane %v266_v19, %v808_v42 }
  0xad   :  { %v310_v56 = vrot.slane %v242_v20, %v808_v42 }
  0xae   :  { %v350_v4 = vsel %vm151_vm3, %v349_v53, %v345_v62 }
  0xaf   :  { %v269_v21 = vpop.xlane.xlu1 %268  ;;  %v311_v7 = vsel %vm151_vm3, %v310_v56, %v306_v3 }
  0xb0   :  { %v245_v22 = vpop.xlane.xlu0 %244  ;;  %v354_v57 = vrot.slane %v269_v21, %v814_v45 }
  0xb1   :  { %v315_v59 = vrot.slane %v245_v22, %v814_v45  ;;  %v233_v22 = vld [vmem:[#allocation3] sm:$0x3] }
  0xb2   :  { %v355_v8 = vsel %vm158_vm4, %v354_v57, %v350_v4 }
  0xb3   :  { %v272_v23 = vpop.xlane.xlu1 %271  ;;  %v316_v10 = vsel %vm158_vm4, %v315_v59, %v311_v7 }
  0xb4   :  { %v248_v24 = vpop.xlane.xlu0 %247  ;;  %v359_v60 = vrot.slane %v272_v23, %v817_v46 }
  0xb5   :  { %v320_v63 = vrot.slane %v248_v24, %v817_v46 }
  0xb6   :  { %v360_v11 = vsel %vm165_vm5, %v359_v60, %v355_v8 }
  0xb7   :  { %v790_v25 = vpop.xlane.xlu1 %73  ;;  %v321_v13 = vsel %vm165_vm5, %v320_v63, %v316_v10 }
  0xb8   :  { %v792_v26 = vpop.xlane.xlu0 %70  ;;  %v143_v37 = vrot.slane %v790_v25, %v803_v39 }
  0xb9   :  { %v138_v40 = vrot.slane %v792_v26, %v811_v44 }
  0xbb   :  { %v794_v28 = vpop.xlane.xlu1 %97 }
  0xbc   :  { %v796_v29 = vpop.xlane.xlu0 %94 }
  0xbd   :  { %v191_v34 = vrot.slane %v796_v29, %v811_v44  ;;  %v145_v44 = vsel %vm144_vm2, %v143_v37, %v138_v40 }
  0xbf   :  { %v275_v31 = vpop.xlane.xlu1 %274 }
  0xc0   :  { %v251_v33 = vpop.xlane.xlu0 %250  ;;  %v364_v0 = vrot.slane %v275_v31, %v821_v49 }
  0xc1   :  { %v325_v5 = vrot.slane %v251_v33, %v821_v49  ;;  %v195_v33 = vrot.slane %v794_v28, %v803_v39 }
  0xc2   :  { %v365_v14 = vsel %vm172_vm6, %v364_v0, %v360_v11  ;;  %v68_v0 = vld [vmem:[#allocation2] sm:$0x3] }
  0xc3   :  { %v800_v38 = vpop.xlane.xlu1 %100  ;;  %v326_v17 = vsel %vm172_vm6, %v325_v5, %v321_v13  ;;  %v196_v51 = vsel %vm144_vm2, %v195_v33, %v191_v34 }
  0xc4   :  { %v805_v41 = vpop.xlane.xlu0 %76  ;;  %v200_v43 = vrot.slane %v800_v38, %v808_v42 }
  0xc6   :  { %v201_v38 = vsel %vm151_vm3, %v200_v43, %v196_v51 }
  0xc7   :  { %v278_v47 = vpop.xlane.xlu1 %277 }
  0xc8   :  { %v254_v50 = vpop.xlane.xlu0 %253  ;;  %v369_v6 = vrot.slane %v278_v47, %v826_v54  ;;  %v150_v47 = vrot.slane %v805_v41, %v808_v42 }
  0xc9   :  { %v330_v9 = vrot.slane %v254_v50, %v826_v54 }
  0xca   :  { %v370_v18 = vsel %vm179_vm7, %v369_v6, %v365_v14 }
  0xcb   :  { %v104_v61 = vpop.xlane.xlu1 %103  ;;  %v331_v20 = vsel %vm179_vm7, %v330_v9, %v326_v17 }
  0xcc   :  { %v80_v1 = vpop.xlane.xlu0 %79  ;;  %v205_v48 = vrot.slane %v104_v61, %v814_v45 }
  0xcd   :  { %v157_v28 = vrot.slane %v80_v1, %v814_v45  ;;  %v152_v45 = vsel %vm151_vm3, %v150_v47, %v145_v44 }
  0xce   :  { %v206_v52 = vsel %vm158_vm4, %v205_v48, %v201_v38 }
  0xcf   :  { %v281_v12 = vpop.xlane.xlu1 %280  ;;  %v159_v55 = vsel %vm158_vm4, %v157_v28, %v152_v45 }
  0xd0   :  { %v374_v15 = vrot.slane %v281_v12, %v838_v2  ;;  %v257_v16 = vpop.xlane.xlu0 %256 }
  0xd1   :  { %v335_v19 = vrot.slane %v257_v16, %v838_v2 }
  0xd2   :  { %v375_v21 = vsel %vm186_vm8, %v374_v15, %v370_v18 }
  0xd3   :  { %v336_v23 = vsel %vm186_vm8, %v335_v19, %v331_v20  ;;  %v107_v24 = vpop.xlane.xlu1 %106  ;;  %v728_v20 = vmov 1966171168  }
  0xd4   :  { %v376_v27 = vsel %vm227_vm9, %v375_v21, %v336_v23  ;;  %v83_v30 = vpop.xlane.xlu0 %82  ;;  %v210_v50 = vrot.slane %v107_v24, %v817_v46  ;;  %v565_v21 = vunpack.c.l.s4 %v728_v20 }
  0xd5   :  { %v378_v31 = vadd.f32 %v376_v27, %v233_v22  ;;  %v164_v25 = vrot.slane %v83_v30, %v817_v46 }
  0xd6   :  { %v211_v46 = vsel %vm165_vm5, %v210_v50, %v206_v52  ;;  %v566_v22 = vunpack.c.0.s8 %v565_v21 }
  0xd7   :  { %v110_v32 = vpop.xlane.xlu1 %109  ;;  %379 = vst.msk [vmem:[#allocation3] sm:$0x3] %vm33_vm0, %v378_v31  ;;  %v166_v57 = vsel %vm165_vm5, %v164_v25, %v159_v55 }
  0xd8   :  { %v86_v36 = vpop.xlane.xlu0 %85  ;;  %v215_v39 = vrot.slane %v110_v32, %v821_v49  ;;  %v569_v23 = vsub.s32 %v566_v22, %v798_v35 }
  0xd9   :  { %v171_v41 = vrot.slane %v86_v36, %v821_v49 }
  0xda   :  { %v216_v58 = vsel %vm172_vm6, %v215_v39, %v211_v46 }
  0xdb   :  { %v113_v29 = vpop.xlane.xlu1 %112  ;;  %v173_v60 = vsel %vm172_vm6, %v171_v41, %v166_v57 }
  0xdc   :  { %v89_v26 = vpop.xlane.xlu0 %88  ;;  %v220_v42 = vrot.slane %v113_v29, %v826_v54 }
  0xdd   :  { %v178_v53 = vrot.slane %v89_v26, %v826_v54 }
  0xde   :  { %v221_v61 = vsel %vm179_vm7, %v220_v42, %v216_v58  ;;  %v384_v5 = vld [vmem:[#allocation3] sm:$0x3] }
  0xdf   :  { %v116_v56 = vpop.xlane.xlu1 %115  ;;  %v180_v54 = vsel %vm179_vm7, %v178_v53, %v173_v60  ;;  %v385_v6 = vmul.f32 0.00390625, %v384_v5 }
  0xe0   :  { %v225_v59 = vrot.slane %v116_v56, %v838_v2  ;;  %v92_v49 = vpop.xlane.xlu0 %91 }
  0xe1   :  { %v185_v62 = vrot.slane %v92_v49, %v838_v2  ;;  %v387_v7 = vrot.slane %v385_v6, 6  ;;  %v474_v2 = vld [vmem:[%s918_s2] sm:$0xf]  ;;  %s729_s2 = smov [#allocation7]  }
  0xe2   :  { %v226_v63 = vsel %vm186_vm8, %v225_v59, %v221_v61  ;;  %643 = vmatpush3.msk.msra.mxu1 %vm479_vm12, %v474_v2  ;;  %s596_s15 = sshll.u32 %s729_s2, 4  ;;  %s597_s15 = int_to_ptr.vmem [resolvable:$true] %s596_s15 }
  0xe3   :  { %v187_v1 = vsel %vm186_vm8, %v185_v62, %v180_v54  ;;  %s695_s16 = scalar_lea.vmem %s597_s15, 32  ;;  %p700_p9 = scmp.lt.s32.totalorder %s597_s15, %s597_s15 }
  0xe4   :  { %v228_v3 = vsel %vm227_vm9, %v226_v63, %v187_v1  ;;  %p696_p8 = scmp.ne.s32.totalorder %s597_s15, %s695_s16  ;;  %p701_p10 = scmp.lt.s32.totalorder %s695_s16, %s695_s16 }
  0xe5   :  { %v230_v4 = vmax.f32 %v68_v0, %v228_v3 }
  0xe6   :  { %p702_p11 = por %p701_p10, %p700_p9 }
  0xe7   :  { %232 = vst.msk [vmem:[#allocation2] sm:$0x3] %vm33_vm0, %v230_v4 }
  0xe8   :  { %p703_p12 = pnand %p702_p11, %p696_p8 }
  0xee   :  { %v383_v8 = vld [vmem:[#allocation2] sm:$0x3] }
  0xef   :  { %v390_v9 = vsel %vm389_vm10, %v383_v8, %v387_v7 }
  0xf0   :  { %640 = vmatmul.mubr.msk.f32.vlgmr.msra.gmra.mrb[0].mxu0 %vm399_vm11, %v390_v9 }
 0x1c3   :  { %v469_v10 = vpop.f32.mrb[0].mxu0 }
 0x1c4   :  { %v473_v11 = vmax.f32 %v469_v10, 0.0  ;;  %v641_v12 = vpop.f32.mrb[1].mxu0 }
 0x1c6   :  { %645 = vmatmul.mubr.msk.f32.vlgmr.msra.gmra.mrb[0].mxu1 %vm475_vm13, %v473_v11 }
 0x299   :  { %v549_v13 = vpop.f32.mrb[0].mxu1 }
 0x29a   :  { %v554_v14 = vrot.slane %v549_v13, 2  ;;  %v646_v15 = vpop.f32.mrb[1].mxu1 }
 0x29c   :  { %v556_v16 = vadd.f32 %v554_v14, %v549_v13 }
 0x29e   :  { %v611_v17 = vmul.f32 -1.442695, %v556_v16 }
 0x2a0   :  { %669 = vpow2.f32 %v611_v17 }
 0x2aa   :  { %v670_v18 = vpop.eup %669 }
 0x2ab   :  { %v560_v19 = vadd.f32 1.0, %v670_v18 }
 0x2ad   :  { %671 = vrcp.f32 %v560_v19 }
 0x2b7   :  { %v672_v24 = vpop.eup %671 }
 0x2b8   :  { %v570_v27 = vrot.slane %v672_v24, %v569_v23 }
 0x2ba   :  { %v571_v30 = vcombine.high %v570_v27, %v570_v27  ;;  %v578_v31 = vrot.slane %v570_v27, %v569_v23 }
 0x2bc   :  { %v585_v32 = vrot.slane %v571_v30, %v569_v23  ;;  %589 = vst.msk [vmem:[#allocation7] sm:$0x1] %vm588_vm14, %v578_v31 }
 0x2be   :  { %590 = vst.msk [vmem:[#allocation7 + $0x1] sm:$0x1] %vm588_vm14, %v585_v32 }
 0x2bf   :  { %706 = shalt.err (!%p703_p12)
}
 0x2c0   :  { %s707_s19 = scalar_lea.hbm %s919_s3, 32 }
 0x2c1   :  { %p708_p13 = scmp.ne.s32.totalorder %s919_s3, %s707_s19  ;;  %p711_p0 = scmp.lt.u32.totalorder %s707_s19, %s919_s3 }
 0x2c3   :  { %p713_p1 = pnand %p711_p0, %p708_p13 }
 0x2c5   :  { %716 = shalt.err (!%p713_p1)
}
 0x2c6   :  { %s730_s25 = smov 1  }
 0x2c7   :  { %602 = dma.vmem_to_hbm [thread:$0]  %s597_s15, 32, %s919_s3, [#allocation6], %s723_s23, %s723_s23, %s730_s25  }
 0x2c8   :  { %719 = dma.done.wait [#allocation6], 32  }
 0x2c9   :  { %720 = vsyncadd [#allocation6], 4294967264 }
 0x2ca   :  { %606 = vsyncpa [#allocation5], 1 }
 0x2cb   :  { %607 = vsyncpa [#allocation6], 1 }

</bundles_post_ra>
